<compile_context>
chip_gen: v5e
topology: v5e:2x2
jax: 0.10.0
libtpu: 0.0.40
codegen_flags: <defaults>
</compile_context>

<pallas_src>
import functools

import jax
import jax.numpy as jnp
from jax import lax
from jax.experimental import pallas as pl
from jax.experimental.pallas import tpu as pltpu

NEG_SLOPE = 0.01  # F.leaky_relu default negative_slope


def _leaky_relu(x):
    return jnp.where(x > 0, x, NEG_SLOPE * x)


def fused_rgcn_kernel(x_ref, adjf_ref,
                      w1_ref, wl1_ref, b1_ref,
                      w2_ref, wl2_ref, b2_ref,
                      aggw_ref, aggb_ref,
                      d1w_ref, d1b_ref, d2w_ref, d2b_ref, d3w_ref, d3b_ref,
                      out_ref, *, num_rels, num_nodes):
    """Two relational graph-conv layers + node-score agg + 3-layer MLP, fully in VMEM.

    Matmul operands are bf16; every accumulation is f32 (preferred_element_type)."""
    f32 = jnp.float32
    bf16 = jnp.bfloat16

    adj_flat = adjf_ref[...]                                   # (R*N, N) bf16, 0/1 entries

    def rel_layer(h, w_rel_ref, w_loop_ref, b_ref):
        # DGL RelGraphConv (basis): sum_r A_r H W_r + H W_loop + b
        # Stacked message matmul: one (R*N, N) @ (N, F) MXU op instead of R separate ones.
        m_all = jnp.dot(adj_flat, h, preferred_element_type=f32).astype(bf16)   # (R*N, F)
        acc = jnp.dot(h, w_loop_ref[...], preferred_element_type=f32) + b_ref[...]
        for r in range(num_rels):                              # static, small
            m_r = m_all[r * num_nodes:(r + 1) * num_nodes, :]  # contiguous static slice
            acc = acc + jnp.dot(m_r, w_rel_ref[r], preferred_element_type=f32)
        return acc                                             # (N, H_out) f32

    x = x_ref[...]                                             # (N, F_in) bf16
    h1 = _leaky_relu(rel_layer(x, w1_ref, wl1_ref, b1_ref)).astype(bf16)
    h2 = rel_layer(h1, w2_ref, wl2_ref, b2_ref).astype(bf16)

    # agg: Linear(hidden, 1) emitted directly as a lane-dense (1, N) score row
    #   s_row = (h2 @ agg_w)^T  via contraction of the hidden axes.
    s_row = lax.dot_general(aggw_ref[...], h2,
                            dimension_numbers=(((0,), (1,)), ((), ())),
                            preferred_element_type=f32)        # (1, N)
    s_row = (s_row + aggb_ref[...]).astype(bf16)
    # self.dp_out: dropout(p=0.5) -> identity in eval mode
    # TODO(synk): training-mode dropout is omitted (eval semantics only).

    # dense_1 -> leaky_relu(dense_2) -> dense_3 (no activation after dense_1, as in torch)
    z1 = (jnp.dot(s_row, d1w_ref[...], preferred_element_type=f32) + d1b_ref[...]).astype(bf16)
    z2 = _leaky_relu(jnp.dot(z1, d2w_ref[...], preferred_element_type=f32)
                     + d2b_ref[...]).astype(bf16)
    out_ref[...] = jnp.dot(z2, d3w_ref[...], preferred_element_type=f32) + d3b_ref[...]


def relational_gcn_forward(x, adj, params):
    N = x.shape[0]
    R = adj.shape[0]
    num_classes = params["d3_w"].shape[-1]
    bf16 = jnp.bfloat16

    # Basis decomposition (host-side glue): W_r = sum_b comp[r, b] * V_b
    w1 = jnp.einsum("rb,bio->rio", params["comp1"], params["v1"])
    w2 = jnp.einsum("rb,bio->rio", params["comp2"], params["v2"])

    # bf16 matmul operands (adjacency is 0/1 -> exact in bf16); biases stay f32.
    adj_flat = adj.reshape(R * N, N).astype(bf16)
    args = (
        x.astype(bf16), adj_flat,
        w1.astype(bf16), params["wl1"].astype(bf16), params["b1"],
        w2.astype(bf16), params["wl2"].astype(bf16), params["b2"],
        params["agg_w"].astype(bf16), params["agg_b"],
        params["d1_w"].astype(bf16), params["d1_b"],
        params["d2_w"].astype(bf16), params["d2_b"],
        params["d3_w"].astype(bf16), params["d3_b"],
    )

    vmem = pl.BlockSpec(memory_space=pltpu.MemorySpace.VMEM)
    kernel = functools.partial(fused_rgcn_kernel, num_rels=R, num_nodes=N)

    return pl.pallas_call(
        kernel,
        out_shape=jax.ShapeDtypeStruct((1, num_classes), jnp.float32),
        in_specs=[vmem] * len(args),
        out_specs=vmem,
        compiler_params=pltpu.CompilerParams(vmem_limit_bytes=32 * 1024 * 1024),
    )(*args)


def _ref_forward(x, adj, p):
    """Pure-JAX reference (einsum-based, structurally independent of the kernel) mirroring the
    kernel's numerics policy: bf16 matmul operands, f32 accumulation."""
    f32 = jnp.float32
    b = lambda t: t.astype(jnp.bfloat16)

    w1 = jnp.einsum("rb,bio->rio", p["comp1"], p["v1"])
    w2 = jnp.einsum("rb,bio->rio", p["comp2"], p["v2"])

    def layer(h, w, wl, bias):                      # h: bf16 (N, F)
        msg = b(jnp.einsum("rij,jf->rif", b(adj), h, preferred_element_type=f32))
        out = jnp.einsum("rif,rfo->io", msg, b(w), preferred_element_type=f32)
        return out + jnp.dot(h, b(wl), preferred_element_type=f32) + bias

    h1 = b(_leaky_relu(layer(b(x), w1, p["wl1"], p["b1"])))
    h2 = b(layer(h1, w2, p["wl2"], p["b2"]))
    s = jnp.dot(h2, b(p["agg_w"]), preferred_element_type=f32) + p["agg_b"]   # (N, 1)
    s = b(s).reshape(1, -1)
    z1 = b(jnp.dot(s, b(p["d1_w"]), preferred_element_type=f32) + p["d1_b"])
    z2 = b(_leaky_relu(jnp.dot(z1, b(p["d2_w"]), preferred_element_type=f32) + p["d2_b"]))
    return (jnp.dot(z2, b(p["d3_w"]), preferred_element_type=f32) + p["d3_b"]).reshape(1, -1)


if __name__ == "__main__":
    key = jax.random.PRNGKey(0)
    # nodes, in_size, hidden, num_rels, num_bases, classes
    N, FIN, HID, R, NB, NC = 16, 8, 32, 3, 8, 4
    keys = jax.random.split(key, 18)

    x = jax.random.normal(keys[0], (N, FIN), jnp.float32)
    adj = (jax.random.uniform(keys[1], (R, N, N)) < 0.2).astype(jnp.float32)

    def init(k, shape, scale=0.1):
        return scale * jax.random.normal(k, shape, jnp.float32)

    params = dict(
        comp1=init(keys[2], (R, NB)),          # basis coefficients, layer 1
        v1=init(keys[3], (NB, FIN, HID)),      # basis matrices, layer 1
        wl1=init(keys[4], (FIN, HID)),         # self-loop weight, layer 1
        b1=init(keys[5], (1, HID)),
        comp2=init(keys[6], (R, NB)),
        v2=init(keys[7], (NB, HID, HID)),
        wl2=init(keys[8], (HID, HID)),
        b2=init(keys[9], (1, HID)),
        agg_w=init(keys[10], (HID, 1)),
        agg_b=init(keys[11], (1, 1)),
        d1_w=init(keys[12], (N, 100)),         # dense_1: Linear(num_nodes, 100)
        d1_b=init(keys[13], (1, 100)),
        d2_w=init(keys[14], (100, 20)),
        d2_b=init(keys[15], (1, 20)),
        d3_w=init(keys[16], (20, NC)),
        d3_b=init(keys[17], (1, NC)),
    )

    fwd = jax.jit(relational_gcn_forward)
    out = jax.block_until_ready(fwd(x, adj, params))
    ref = _ref_forward(x, adj, params)

    assert out.shape == (1, NC), out.shape
    assert jnp.allclose(out, ref, atol=1e-4, rtol=1e-3), (out, ref)
    print("KERNEL_OK")
</pallas_src>

<mosaic_0001>
module attributes {stable_mosaic.version = 11 : i64} {
  func.func @fused_rgcn_kernel(%arg0: memref<16x8xbf16, #tpu.memory_space<vmem>>, %arg1: memref<48x16xbf16, #tpu.memory_space<vmem>>, %arg2: memref<3x8x32xbf16, #tpu.memory_space<vmem>>, %arg3: memref<8x32xbf16, #tpu.memory_space<vmem>>, %arg4: memref<1x32xf32, #tpu.memory_space<vmem>>, %arg5: memref<3x32x32xbf16, #tpu.memory_space<vmem>>, %arg6: memref<32x32xbf16, #tpu.memory_space<vmem>>, %arg7: memref<1x32xf32, #tpu.memory_space<vmem>>, %arg8: memref<32x1xbf16, #tpu.memory_space<vmem>>, %arg9: memref<1x1xf32, #tpu.memory_space<vmem>>, %arg10: memref<16x100xbf16, #tpu.memory_space<vmem>>, %arg11: memref<1x100xf32, #tpu.memory_space<vmem>>, %arg12: memref<100x20xbf16, #tpu.memory_space<vmem>>, %arg13: memref<1x20xf32, #tpu.memory_space<vmem>>, %arg14: memref<20x4xbf16, #tpu.memory_space<vmem>>, %arg15: memref<1x4xf32, #tpu.memory_space<vmem>>, %arg16: memref<1x4xf32, #tpu.memory_space<vmem>>) attributes {dimension_semantics = [], scalar_prefetch = 0 : i64, scratch_operands = 0 : i64, tpu.core_type = #tpu.core_type<tc>} {
    %c0 = arith.constant 0 : index
    %c0_0 = arith.constant 0 : index
    %0 = vector.load %arg1[%c0, %c0_0] : memref<48x16xbf16, #tpu.memory_space<vmem>>, vector<48x16xbf16>
    %c0_1 = arith.constant 0 : index
    %c0_2 = arith.constant 0 : index
    %1 = vector.load %arg0[%c0_1, %c0_2] : memref<16x8xbf16, #tpu.memory_space<vmem>>, vector<16x8xbf16>
    %cst = arith.constant dense<0.000000e+00> : vector<48x8xf32>
    %2 = tpu.matmul %0, %1, %cst {dimension_numbers = #tpu.dot_dimension_numbers<[1], [0], [0], [1], [0, 0, 1, 1], [], []>} : vector<48x16xbf16>, vector<16x8xbf16>, vector<48x8xf32> -> vector<48x8xf32>
    %3 = arith.truncf %2 : vector<48x8xf32> to vector<48x8xbf16>
    %c0_3 = arith.constant 0 : index
    %c0_4 = arith.constant 0 : index
    %4 = vector.load %arg3[%c0_3, %c0_4] : memref<8x32xbf16, #tpu.memory_space<vmem>>, vector<8x32xbf16>
    %cst_5 = arith.constant dense<0.000000e+00> : vector<16x32xf32>
    %5 = tpu.matmul %1, %4, %cst_5 {dimension_numbers = #tpu.dot_dimension_numbers<[1], [0], [0], [1], [0, 0, 1, 1], [], []>} : vector<16x8xbf16>, vector<8x32xbf16>, vector<16x32xf32> -> vector<16x32xf32>
    %c0_6 = arith.constant 0 : index
    %c0_7 = arith.constant 0 : index
    %6 = vector.load %arg4[%c0_6, %c0_7] : memref<1x32xf32, #tpu.memory_space<vmem>>, vector<1x32xf32>
    %7 = vector.broadcast %6 : vector<1x32xf32> to vector<16x32xf32>
    %8 = arith.addf %5, %7 : vector<16x32xf32>
    %9 = vector.extract_strided_slice %3 {offsets = [0, 0], sizes = [16, 8], strides = [1, 1]} : vector<48x8xbf16> to vector<16x8xbf16>
    %c0_8 = arith.constant 0 : index
    %c0_9 = arith.constant 0 : index
    %c0_10 = arith.constant 0 : index
    %10 = vector.load %arg2[%c0_8, %c0_9, %c0_10] : memref<3x8x32xbf16, #tpu.memory_space<vmem>>, vector<1x8x32xbf16>
    %11 = vector.shape_cast %10 : vector<1x8x32xbf16> to vector<8x32xbf16>
    %cst_11 = arith.constant dense<0.000000e+00> : vector<16x32xf32>
    %12 = tpu.matmul %9, %11, %cst_11 {dimension_numbers = #tpu.dot_dimension_numbers<[1], [0], [0], [1], [0, 0, 1, 1], [], []>} : vector<16x8xbf16>, vector<8x32xbf16>, vector<16x32xf32> -> vector<16x32xf32>
    %13 = arith.addf %8, %12 : vector<16x32xf32>
    %14 = vector.extract_strided_slice %3 {offsets = [16, 0], sizes = [16, 8], strides = [1, 1]} : vector<48x8xbf16> to vector<16x8xbf16>
    %c1 = arith.constant 1 : index
    %c0_12 = arith.constant 0 : index
    %c0_13 = arith.constant 0 : index
    %15 = vector.load %arg2[%c1, %c0_12, %c0_13] : memref<3x8x32xbf16, #tpu.memory_space<vmem>>, vector<1x8x32xbf16>
    %16 = vector.shape_cast %15 : vector<1x8x32xbf16> to vector<8x32xbf16>
    %cst_14 = arith.constant dense<0.000000e+00> : vector<16x32xf32>
    %17 = tpu.matmul %14, %16, %cst_14 {dimension_numbers = #tpu.dot_dimension_numbers<[1], [0], [0], [1], [0, 0, 1, 1], [], []>} : vector<16x8xbf16>, vector<8x32xbf16>, vector<16x32xf32> -> vector<16x32xf32>
    %18 = arith.addf %13, %17 : vector<16x32xf32>
    %19 = vector.extract_strided_slice %3 {offsets = [32, 0], sizes = [16, 8], strides = [1, 1]} : vector<48x8xbf16> to vector<16x8xbf16>
    %c2 = arith.constant 2 : index
    %c0_15 = arith.constant 0 : index
    %c0_16 = arith.constant 0 : index
    %20 = vector.load %arg2[%c2, %c0_15, %c0_16] : memref<3x8x32xbf16, #tpu.memory_space<vmem>>, vector<1x8x32xbf16>
    %21 = vector.shape_cast %20 : vector<1x8x32xbf16> to vector<8x32xbf16>
    %cst_17 = arith.constant dense<0.000000e+00> : vector<16x32xf32>
    %22 = tpu.matmul %19, %21, %cst_17 {dimension_numbers = #tpu.dot_dimension_numbers<[1], [0], [0], [1], [0, 0, 1, 1], [], []>} : vector<16x8xbf16>, vector<8x32xbf16>, vector<16x32xf32> -> vector<16x32xf32>
    %23 = arith.addf %18, %22 : vector<16x32xf32>
    %cst_18 = arith.constant 0.000000e+00 : f32
    %24 = vector.broadcast %cst_18 : f32 to vector<16x32xf32>
    %25 = arith.cmpf ogt, %23, %24 : vector<16x32xf32>
    %cst_19 = arith.constant 0.00999999977 : f32
    %26 = vector.broadcast %cst_19 : f32 to vector<16x32xf32>
    %27 = arith.mulf %26, %23 : vector<16x32xf32>
    %28 = arith.select %25, %23, %27 : vector<16x32xi1>, vector<16x32xf32>
    %29 = arith.truncf %28 : vector<16x32xf32> to vector<16x32xbf16>
    %cst_20 = arith.constant dense<0.000000e+00> : vector<48x32xf32>
    %30 = tpu.matmul %0, %29, %cst_20 {dimension_numbers = #tpu.dot_dimension_numbers<[1], [0], [0], [1], [0, 0, 1, 1], [], []>} : vector<48x16xbf16>, vector<16x32xbf16>, vector<48x32xf32> -> vector<48x32xf32>
    %31 = arith.truncf %30 : vector<48x32xf32> to vector<48x32xbf16>
    %c0_21 = arith.constant 0 : index
    %c0_22 = arith.constant 0 : index
    %32 = vector.load %arg6[%c0_21, %c0_22] : memref<32x32xbf16, #tpu.memory_space<vmem>>, vector<32x32xbf16>
    %cst_23 = arith.constant dense<0.000000e+00> : vector<16x32xf32>
    %33 = tpu.matmul %29, %32, %cst_23 {dimension_numbers = #tpu.dot_dimension_numbers<[1], [0], [0], [1], [0, 0, 1, 1], [], []>} : vector<16x32xbf16>, vector<32x32xbf16>, vector<16x32xf32> -> vector<16x32xf32>
    %c0_24 = arith.constant 0 : index
    %c0_25 = arith.constant 0 : index
    %34 = vector.load %arg7[%c0_24, %c0_25] : memref<1x32xf32, #tpu.memory_space<vmem>>, vector<1x32xf32>
    %35 = vector.broadcast %34 : vector<1x32xf32> to vector<16x32xf32>
    %36 = arith.addf %33, %35 : vector<16x32xf32>
    %37 = vector.extract_strided_slice %31 {offsets = [0, 0], sizes = [16, 32], strides = [1, 1]} : vector<48x32xbf16> to vector<16x32xbf16>
    %c0_26 = arith.constant 0 : index
    %c0_27 = arith.constant 0 : index
    %c0_28 = arith.constant 0 : index
    %38 = vector.load %arg5[%c0_26, %c0_27, %c0_28] : memref<3x32x32xbf16, #tpu.memory_space<vmem>>, vector<1x32x32xbf16>
    %39 = vector.shape_cast %38 : vector<1x32x32xbf16> to vector<32x32xbf16>
    %cst_29 = arith.constant dense<0.000000e+00> : vector<16x32xf32>
    %40 = tpu.matmul %37, %39, %cst_29 {dimension_numbers = #tpu.dot_dimension_numbers<[1], [0], [0], [1], [0, 0, 1, 1], [], []>} : vector<16x32xbf16>, vector<32x32xbf16>, vector<16x32xf32> -> vector<16x32xf32>
    %41 = arith.addf %36, %40 : vector<16x32xf32>
    %42 = vector.extract_strided_slice %31 {offsets = [16, 0], sizes = [16, 32], strides = [1, 1]} : vector<48x32xbf16> to vector<16x32xbf16>
    %c1_30 = arith.constant 1 : index
    %c0_31 = arith.constant 0 : index
    %c0_32 = arith.constant 0 : index
    %43 = vector.load %arg5[%c1_30, %c0_31, %c0_32] : memref<3x32x32xbf16, #tpu.memory_space<vmem>>, vector<1x32x32xbf16>
    %44 = vector.shape_cast %43 : vector<1x32x32xbf16> to vector<32x32xbf16>
    %cst_33 = arith.constant dense<0.000000e+00> : vector<16x32xf32>
    %45 = tpu.matmul %42, %44, %cst_33 {dimension_numbers = #tpu.dot_dimension_numbers<[1], [0], [0], [1], [0, 0, 1, 1], [], []>} : vector<16x32xbf16>, vector<32x32xbf16>, vector<16x32xf32> -> vector<16x32xf32>
    %46 = arith.addf %41, %45 : vector<16x32xf32>
    %47 = vector.extract_strided_slice %31 {offsets = [32, 0], sizes = [16, 32], strides = [1, 1]} : vector<48x32xbf16> to vector<16x32xbf16>
    %c2_34 = arith.constant 2 : index
    %c0_35 = arith.constant 0 : index
    %c0_36 = arith.constant 0 : index
    %48 = vector.load %arg5[%c2_34, %c0_35, %c0_36] : memref<3x32x32xbf16, #tpu.memory_space<vmem>>, vector<1x32x32xbf16>
    %49 = vector.shape_cast %48 : vector<1x32x32xbf16> to vector<32x32xbf16>
    %cst_37 = arith.constant dense<0.000000e+00> : vector<16x32xf32>
    %50 = tpu.matmul %47, %49, %cst_37 {dimension_numbers = #tpu.dot_dimension_numbers<[1], [0], [0], [1], [0, 0, 1, 1], [], []>} : vector<16x32xbf16>, vector<32x32xbf16>, vector<16x32xf32> -> vector<16x32xf32>
    %51 = arith.addf %46, %50 : vector<16x32xf32>
    %52 = arith.truncf %51 : vector<16x32xf32> to vector<16x32xbf16>
    %c0_38 = arith.constant 0 : index
    %c0_39 = arith.constant 0 : index
    %53 = vector.load %arg8[%c0_38, %c0_39] : memref<32x1xbf16, #tpu.memory_space<vmem>>, vector<32x1xbf16>
    %cst_40 = arith.constant dense<0.000000e+00> : vector<1x16xf32>
    %54 = tpu.matmul %53, %52, %cst_40 {dimension_numbers = #tpu.dot_dimension_numbers<[0], [1], [1], [0], [0, 1, 1, 0], [], []>} : vector<32x1xbf16>, vector<16x32xbf16>, vector<1x16xf32> -> vector<1x16xf32>
    %c0_41 = arith.constant 0 : index
    %c0_42 = arith.constant 0 : index
    %55 = vector.load %arg9[%c0_41, %c0_42] : memref<1x1xf32, #tpu.memory_space<vmem>>, vector<1x1xf32>
    %56 = vector.broadcast %55 : vector<1x1xf32> to vector<1x16xf32>
    %57 = arith.addf %54, %56 : vector<1x16xf32>
    %58 = arith.truncf %57 : vector<1x16xf32> to vector<1x16xbf16>
    %c0_43 = arith.constant 0 : index
    %c0_44 = arith.constant 0 : index
    %59 = vector.load %arg10[%c0_43, %c0_44] : memref<16x100xbf16, #tpu.memory_space<vmem>>, vector<16x100xbf16>
    %cst_45 = arith.constant dense<0.000000e+00> : vector<1x100xf32>
    %60 = tpu.matmul %58, %59, %cst_45 {dimension_numbers = #tpu.dot_dimension_numbers<[1], [0], [0], [1], [0, 0, 1, 1], [], []>} : vector<1x16xbf16>, vector<16x100xbf16>, vector<1x100xf32> -> vector<1x100xf32>
    %c0_46 = arith.constant 0 : index
    %c0_47 = arith.constant 0 : index
    %61 = vector.load %arg11[%c0_46, %c0_47] : memref<1x100xf32, #tpu.memory_space<vmem>>, vector<1x100xf32>
    %62 = arith.addf %60, %61 : vector<1x100xf32>
    %63 = arith.truncf %62 : vector<1x100xf32> to vector<1x100xbf16>
    %c0_48 = arith.constant 0 : index
    %c0_49 = arith.constant 0 : index
    %64 = vector.load %arg12[%c0_48, %c0_49] : memref<100x20xbf16, #tpu.memory_space<vmem>>, vector<100x20xbf16>
    %cst_50 = arith.constant dense<0.000000e+00> : vector<1x20xf32>
    %65 = tpu.matmul %63, %64, %cst_50 {dimension_numbers = #tpu.dot_dimension_numbers<[1], [0], [0], [1], [0, 0, 1, 1], [], []>} : vector<1x100xbf16>, vector<100x20xbf16>, vector<1x20xf32> -> vector<1x20xf32>
    %c0_51 = arith.constant 0 : index
    %c0_52 = arith.constant 0 : index
    %66 = vector.load %arg13[%c0_51, %c0_52] : memref<1x20xf32, #tpu.memory_space<vmem>>, vector<1x20xf32>
    %67 = arith.addf %65, %66 : vector<1x20xf32>
    %cst_53 = arith.constant 0.000000e+00 : f32
    %68 = vector.broadcast %cst_53 : f32 to vector<1x20xf32>
    %69 = arith.cmpf ogt, %67, %68 : vector<1x20xf32>
    %cst_54 = arith.constant 0.00999999977 : f32
    %70 = vector.broadcast %cst_54 : f32 to vector<1x20xf32>
    %71 = arith.mulf %70, %67 : vector<1x20xf32>
    %72 = arith.select %69, %67, %71 : vector<1x20xi1>, vector<1x20xf32>
    %73 = arith.truncf %72 : vector<1x20xf32> to vector<1x20xbf16>
    %c0_55 = arith.constant 0 : index
    %c0_56 = arith.constant 0 : index
    %74 = vector.load %arg14[%c0_55, %c0_56] : memref<20x4xbf16, #tpu.memory_space<vmem>>, vector<20x4xbf16>
    %cst_57 = arith.constant dense<0.000000e+00> : vector<1x4xf32>
    %75 = tpu.matmul %73, %74, %cst_57 {dimension_numbers = #tpu.dot_dimension_numbers<[1], [0], [0], [1], [0, 0, 1, 1], [], []>} : vector<1x20xbf16>, vector<20x4xbf16>, vector<1x4xf32> -> vector<1x4xf32>
    %c0_58 = arith.constant 0 : index
    %c0_59 = arith.constant 0 : index
    %76 = vector.load %arg15[%c0_58, %c0_59] : memref<1x4xf32, #tpu.memory_space<vmem>>, vector<1x4xf32>
    %77 = arith.addf %75, %76 : vector<1x4xf32>
    %c0_60 = arith.constant 0 : index
    %c0_61 = arith.constant 0 : index
    %78 = vector.load %arg16[%c0_60, %c0_61] : memref<1x4xf32, #tpu.memory_space<vmem>>, vector<1x4xf32>
    tpu.vector_store %arg16[%c0_60, %c0_61], %77 {strides = array<i32>} : memref<1x4xf32, #tpu.memory_space<vmem>>, vector<1x4xf32>,
    return
  }
}

</mosaic_0001>

<bundles_post_ra>
// kernel: relational_gcn_forward.1
= control target key start
LH: loop header
LB: loop body
LE: loop exit
PB: predicated region body
PF: predicated region fallthrough
CT: control target
= control target key end

     0   :  { %s1048_s0 = inlined_call_operand.vmem [shape: bf16[16,8], index: 0, kind: input, shape index: {}]   ;;  %s1049_s1 = inlined_call_operand.vmem [shape: bf16[48,16], index: 1, kind: input, shape index: {}]   ;;  %s1050_s2 = inlined_call_operand.vmem [shape: bf16[3,8,32], index: 2, kind: input, shape index: {}]   ;;  %s1051_s3 = inlined_call_operand.vmem [shape: bf16[8,32], index: 3, kind: input, shape index: {}]   ;;  %s1052_s4 = inlined_call_operand.vmem [shape: f32[1,32], index: 4, kind: input, shape index: {}]   ;;  %s1053_s5 = inlined_call_operand.vmem [shape: bf16[3,32,32], index: 5, kind: input, shape index: {}]   ;;  %s1054_s6 = inlined_call_operand.vmem [shape: bf16[32,32], index: 6, kind: input, shape index: {}]   ;;  %s1055_s7 = inlined_call_operand.vmem [shape: f32[1,32], index: 7, kind: input, shape index: {}]   ;;  %s1056_s8 = inlined_call_operand.vmem [shape: bf16[32,1], index: 8, kind: input, shape index: {}]   ;;  %s1057_s9 = inlined_call_operand.<no memory space> [shape: f32[1,1], index: 9, kind: input, shape index: {}]   ;;  %s1058_s10 = inlined_call_operand.vmem [shape: bf16[16,100], index: 10, kind: input, shape index: {}]   ;;  %s1059_s11 = inlined_call_operand.vmem [shape: f32[1,100], index: 11, kind: input, shape index: {}]   ;;  %s1060_s12 = inlined_call_operand.vmem [shape: bf16[100,20], index: 12, kind: input, shape index: {}]   ;;  %s1061_s13 = inlined_call_operand.vmem [shape: f32[1,20], index: 13, kind: input, shape index: {}]   ;;  %s1062_s14 = inlined_call_operand.vmem [shape: bf16[20,4], index: 14, kind: input, shape index: {}]   ;;  %s1063_s15 = inlined_call_operand.vmem [shape: f32[1,4], index: 15, kind: input, shape index: {}]   ;;  %s1064_s16 = inlined_call_operand.hbm [shape: f32[1,4], index: 16, kind: output, shape index: {}]  }
   0x1   :  { %1065 = sst [smem:[#allocation6_spill]] %s1048_s0  ;;  %v21_v0 = vstv %s1057_s9 }
   0x2   :  { %22 = vst [vmem:[#allocation2] sm:$0x1] %v21_v0 }
   0x3   :  { %s1066_s25 = sld [smem:[#allocation6_spill]]  ;;  %v917_v2 = vld [vmem:[%s1049_s1] sm:$0xff]  ;;  %vm86_vm0 = vcmask 130048  }
   0x9   :  { %v770_v1 = vld [vmem:[%s1066_s25] sm:$0xff] }
   0xa   :  { %103 = vmatpush.bf16.msra.mxu0 %v770_v1 }
   0xb   :  { %23 = vsyncpa [#allocation4], 0  ;;  %v924_v3 = vld [vmem:[%s1049_s1 + $0x8] sm:$0xff]  ;;  %v931_v4 = vld [vmem:[%s1049_s1 + $0x10] sm:$0xff]  ;;  %vm135_vm1 = vcmask 1043456   ;;  %vm131_vm2 = vcmask 64512  }
   0xc   :  { %v153_v5 = vld [vmem:[%s1050_s2] sm:$0xf]  ;;  %v672_v9 = vld [vmem:[%s1050_s2 + $0x4] sm:$0xf]  ;;  %v674_v15 = vld [vmem:[%s1050_s2 + $0x8] sm:$0xf] }
   0xd   :  { %667 = vmatmul.msk.bf16.vlgmr.msra.gmra.mxu0 %vm86_vm0, %v917_v2  ;;  %v163_v6 = vsel %vm135_vm1, %v153_v5, 0  ;;  %v126_v7 = vld [vmem:[%s1051_s3] sm:$0xf]  ;;  %v192_v10 = vsel %vm135_vm1, %v672_v9, 0  ;;  %v221_v18 = vsel %vm135_vm1, %v674_v15, 0  ;;  %v772_v34 = vld [vmem:[%s1054_s6 + $0x8] sm:$0xff] }
   0xe   :  { %172 = vmatpush.bf16.msra.mxu2 %v163_v6  ;;  %v137_v8 = vsel %vm135_vm1, %v126_v7, 0  ;;  %201 = vmatpush.bf16.msra.mxu3 %v192_v10  ;;  %v771_v35 = vld [vmem:[%s1054_s6] sm:$0xff]  ;;  %vm296_vm5 = vcmask 261120   ;;  %v774_v58 = vld [vmem:[%s1053_s5 + $0x8] sm:$0xff]  ;;  %v776_v62 = vld [vmem:[%s1053_s5 + $0x18] sm:$0xff]  ;;  %vm579_vm6 = vcmask 1041408  }
   0xf   :  { %146 = vmatpush.bf16.msra.mxu1 %v137_v8  ;;  %v793_v39 = vld [vmem:[%s1052_s4] ss:$0 sm:$0xff]  ;;  %v778_v60 = vld [vmem:[%s1053_s5 + $0x28] sm:$0xff]  ;;  %v775_v63 = vld [vmem:[%s1053_s5 + $0x10] sm:$0xff]  ;;  %vm575_vm7 = vcmask 818176   ;;  %vm613_vm9 = vcmask 162816  }
  0x10   :  { %v773_v59 = vld [vmem:[%s1053_s5] sm:$0xff]  ;;  %426 = vmatpush.bf16.msrb.mxu0 %v778_v60  ;;  %s642_s23 = sshll.u32 %s1064_s16, 4  ;;  %vm633_vm10 = vcmask 24576   ;;  %s643_s23 = int_to_ptr.hbm [resolvable:$true] %s642_s23 }
  0x11   :  { %v779_v61 = vld [vmem:[%s1056_s8] sm:$0xff] }
  0x12   :  { %670 = vmatmul.msk.bf16.vlgmr.msra.gmra.mxu1 %vm131_vm2, %v770_v1  ;;  %306 = vmatpush.bf16.msrb.mxu3 %v772_v34  ;;  %v780_v1 = vld [vmem:[%s1056_s8 + $0x8] sm:$0xff]  ;;  %s822_s8 = smov [#allocation3]  }
  0x13   :  { %230 = vmatpush.bf16.msrb.mxu1 %v221_v18  ;;  %460 = vxpose.xlu0.c.b16.start [1/2] (short) (narrow) %v779_v61, 16  ;;  %v782_v61 = vld [vmem:[%s1060_s12] sm:$0xff] }
  0x16   :  { %307 = vmatpush.bf16.msrb.mxu3 %v771_v35 }
  0x17   :  { %344 = vmatpush.bf16.msra.mxu1 %v774_v58 }
  0x1b   :  { %345 = vmatpush.bf16.msra.mxu1 %v773_v59 }
  0x1d   :  { %668 = vmatmul.msk.bf16.gmra.mxu0 %vm86_vm0, %v924_v3 }
  0x23   :  { %461 = vxpose.xlu0.c.b16.end [2/2] (short) (narrow) %v780_v1, 16 }
  0x2d   :  { %669 = vmatmul.msk.bf16.gmra.mxu0 %vm86_vm0, %v931_v4 }
  0x8a   :  { %v105_v11 = vpop.f32.mrf.mxu0 }
  0x8b   :  { %v120_v12 = vpack.c.bf16 %v105_v11, %v105_v11 }
  0x8d   :  { %v156_v16 = vunpack.c.l.b16 %v120_v12 }
  0x8f   :  { %v148_v36 = vpop.f32.mrf.mxu1 }
  0x90   :  { %v149_v41 = vadd.f32 %v793_v39, %v148_v36 }
  0x92   :  { %v107_v13 = vpop.f32.mrf.mxu0 }
  0x93   :  { %v121_v14 = vpack.c.bf16 %v107_v13, %v107_v13 }
  0x95   :  { %v157_v17 = vunpack.c.l.b16 %v121_v14 }
  0x97   :  { %v158_v19 = vpack.c.b16 %v157_v17, %v156_v16  ;;  %v150_v38 = vpop.f32.mrf.mxu1 }
  0x98   :  { %v151_v44 = vadd.f32 %v793_v39, %v150_v38 }
  0x99   :  { %671 = vmatmul.msk.bf16.vlgmr.msra.gmra.mxu2 %vm131_vm2, %v158_v19 }
  0x9a   :  { %v110_v20 = vpop.f32.mrf.mxu0 }
  0x9b   :  { %v122_v21 = vpack.c.bf16 %v110_v20, %v110_v20 }
  0x9d   :  { %v185_v24 = vunpack.c.l.b16 %v122_v21 }
  0xa2   :  { %v112_v22 = vpop.f32.mrf.mxu0 }
  0xa3   :  { %v123_v23 = vpack.c.bf16 %v112_v22, %v112_v22 }
  0xa5   :  { %v186_v25 = vunpack.c.l.b16 %v123_v23 }
  0xa7   :  { %v187_v26 = vpack.c.b16 %v186_v25, %v185_v24  ;;  %v441_v25 = vld [vmem:[#allocation2] sm:$0x1] }
  0xa9   :  { %673 = vmatmul.msk.bf16.vlgmr.msra.gmra.mxu3 %vm131_vm2, %v187_v26  ;;  %v821_v26 = vmov 0  }
  0xaa   :  { %v115_v27 = vpop.f32.mrf.mxu0  ;;  %385 = vmatpush.bf16.msra.mxu3 %v776_v62  ;;  %791 = vset.pattern.permute.xlu1 %v821_v26  ;;  %v498_v62 = vld [vmem:[%s1059_s11] sm:$0x1] }
  0xab   :  { %v124_v28 = vpack.c.bf16 %v115_v27, %v115_v27  ;;  %792 = vset.pattern.permute.xlu0 %v821_v26  ;;  %444 = vperm.xlu1 %791, %v441_v25  }
  0xad   :  { %v214_v31 = vunpack.c.l.b16 %v124_v28 }
  0xae   :  { %386 = vmatpush.bf16.msra.mxu3 %v775_v63 }
  0xb2   :  { %v117_v29 = vpop.f32.mrf.mxu0 }
  0xb3   :  { %v125_v30 = vpack.c.bf16 %v117_v29, %v117_v29  ;;  %v794_v29 = vld [vmem:[%s1055_s7] ss:$0 sm:$0xff] }
  0xb5   :  { %v215_v32 = vunpack.c.l.b16 %v125_v30 }
  0xb7   :  { %v216_v33 = vpack.c.b16 %v215_v32, %v214_v31 }
  0xb9   :  { %675 = vmatmul.msk.bf16.vlgmr.msrb.gmra.mxu1 %vm131_vm2, %v216_v33 }
 0x11c   :  { %v174_v37 = vpop.f32.mrf.mxu2 }
 0x11d   :  { %v179_v43 = vadd.f32 %v174_v37, %v149_v41 }
 0x124   :  { %v176_v45 = vpop.f32.mrf.mxu2 }
 0x125   :  { %v180_v48 = vadd.f32 %v176_v45, %v151_v44  ;;  %v468_v44 = vpop.trf.xlu0  ;;  %v781_v45 = vld [vmem:[%s1058_s10] sm:$0xff] }
 0x12c   :  { %v203_v40 = vpop.f32.mrf.mxu3 }
 0x12d   :  { %v208_v46 = vadd.f32 %v203_v40, %v179_v43 }
 0x134   :  { %v205_v47 = vpop.f32.mrf.mxu3 }
 0x135   :  { %v209_v50 = vadd.f32 %v205_v47, %v180_v48 }
 0x136   :  { %v232_v42 = vpop.f32.mrf.mxu1 }
 0x137   :  { %v237_v49 = vadd.f32 %v232_v42, %v208_v46  ;;  %v534_v46 = vld [vmem:[%s1060_s12 + $0x30] sm:$0x3] }
 0x138   :  { %v561_v47 = vunpack.c.l.b16 %v534_v46 }
 0x139   :  { %v241_v52 = vmul.f32 0.01, %v237_v49  ;;  %vm239_vm3 = vcmp.gt.f32.partialorder %v237_v49, 0.0 }
 0x13a   :  { %v568_v48 = vpack.c.b16 %v561_v47, %v561_v47 }
 0x13b   :  { %v243_v55 = vsel %vm239_vm3, %v237_v49, %v241_v52  ;;  %v785_v52 = vld [vmem:[%s1060_s12 + $0x18] sm:$0xff] }
 0x13c   :  { %v581_v49 = vsel %vm579_vm6, %v568_v48, 0 }
 0x13e   :  { %v234_v51 = vpop.f32.mrf.mxu1 }
 0x13f   :  { %v238_v53 = vadd.f32 %v234_v51, %v209_v50  ;;  %v787_v50 = vld [vmem:[%s1060_s12 + $0x28] sm:$0xff]  ;;  %v786_v51 = vld [vmem:[%s1060_s12 + $0x20] sm:$0xff] }
 0x141   :  { %v242_v54 = vmul.f32 0.01, %v238_v53  ;;  %vm240_vm4 = vcmp.gt.f32.partialorder %v238_v53, 0.0 }
 0x143   :  { %v244_v56 = vsel %vm240_vm4, %v238_v53, %v242_v54  ;;  %v445_v53 = vpop.permute.xlu1 %444  ;;  %v784_v54 = vld [vmem:[%s1060_s12 + $0x10] sm:$0xff] }
 0x144   :  { %v245_v57 = vpack.c.bf16 %v244_v56, %v243_v55  ;;  %v447_v55 = vperm.slane %v445_v53, 0  ;;  %v783_v56 = vld [vmem:[%s1060_s12 + $0x8] sm:$0xff] }
 0x146   :  { %253 = vmatpush.bf16.msrb.mxu2 %v245_v57  ;;  %687 = vmatmul.msk.bf16.vlgmr.msrb.gmra.mxu3 %vm296_vm5, %v245_v57 }
 0x147   :  { %515 = vmatpush.bf16.msrb.mxu3 %v781_v45 }
 0x149   :  { %676 = vmatmul.msk.bf16.vlgmr.msrb.gmra.mxu2 %vm86_vm0, %v917_v2  ;;  %v777_v2 = vld [vmem:[%s1053_s5 + $0x20] sm:$0xff] }
 0x14a   :  { %427 = vmatpush.bf16.msrb.mxu0 %v777_v2  ;;  %584 = vmatpush.bf16.msra.mxu2 %v581_v49 }
 0x14e   :  { %585 = vmatpush.bf16.msra.mxu2 %v787_v50 }
 0x152   :  { %586 = vmatpush.bf16.msra.mxu2 %v786_v51 }
 0x156   :  { %587 = vmatpush.bf16.msra.mxu2 %v785_v52 }
 0x159   :  { %677 = vmatmul.msk.bf16.gmra.mxu2 %vm86_vm0, %v924_v3 }
 0x15a   :  { %588 = vmatpush.bf16.msra.mxu2 %v784_v54 }
 0x15e   :  { %589 = vmatpush.bf16.msra.mxu2 %v783_v56 }
 0x162   :  { %590 = vmatpush.bf16.msra.mxu2 %v782_v61 }
 0x169   :  { %678 = vmatmul.msk.bf16.gmra.mxu2 %vm86_vm0, %v931_v4 }
 0x1c9   :  { %v309_v23 = vpop.f32.mrf.mxu3 }
 0x1ca   :  { %v310_v32 = vadd.f32 %v794_v29, %v309_v23 }
 0x1cc   :  { %v255_v0 = vpop.f32.mrf.mxu2 }
 0x1cd   :  { %v270_v3 = vpack.c.bf16 %v255_v0, %v255_v0 }
 0x1cf   :  { %v320_v6 = vunpack.c.l.b16 %v270_v3  ;;  %v602_v3 = vld [vmem:[%s1062_s14 + $0x8] sm:$0x3] }
 0x1d1   :  { %v311_v24 = vpop.f32.mrf.mxu3 }
 0x1d2   :  { %v312_v33 = vadd.f32 %v794_v29, %v311_v24 }
 0x1d4   :  { %v257_v4 = vpop.f32.mrf.mxu2 }
 0x1d5   :  { %v271_v5 = vpack.c.bf16 %v257_v4, %v257_v4  ;;  %v609_v4 = vunpack.c.l.b16 %v602_v3 }
 0x1d7   :  { %v321_v7 = vunpack.c.l.b16 %v271_v5  ;;  %v611_v5 = vpack.c.b16 %v609_v4, %v609_v4 }
 0x1d9   :  { %v322_v8 = vpack.c.b16 %v321_v7, %v320_v6  ;;  %v618_v6 = vsel %vm579_vm6, %v611_v5, 0  ;;  %v788_v7 = vld [vmem:[%s1062_s14] sm:$0xff]  ;;  %s640_s14 = sshll.u32 %s822_s8, 4  ;;  %s641_s14 = int_to_ptr.vmem [resolvable:$true] %s640_s14 }
 0x1da   :  { %626 = vmatpush.bf16.msra.mxu0 %v618_v6 }
 0x1db   :  { %696 = vmatmul.msk.bf16.vlgmr.msra.gmra.mxu1 %vm296_vm5, %v322_v8  ;;  %v535_v8 = vld [vmem:[%s1061_s13] sm:$0x1] }
 0x1dc   :  { %v260_v9 = vpop.f32.mrf.mxu2 }
 0x1dd   :  { %v272_v10 = vpack.c.bf16 %v260_v9, %v260_v9 }
 0x1de   :  { %627 = vmatpush.bf16.msra.mxu0 %v788_v7 }
 0x1df   :  { %v361_v13 = vunpack.c.l.b16 %v272_v10 }
 0x1e4   :  { %v262_v11 = vpop.f32.mrf.mxu2 }
 0x1e5   :  { %v273_v12 = vpack.c.bf16 %v262_v11, %v262_v11 }
 0x1e7   :  { %v362_v14 = vunpack.c.l.b16 %v273_v12 }
 0x1e9   :  { %v363_v15 = vpack.c.b16 %v362_v14, %v361_v13 }
 0x1eb   :  { %709 = vmatmul.msk.bf16.vlgmr.msra.gmra.mxu3 %vm296_vm5, %v363_v15  ;;  %v603_v15 = vld [vmem:[%s1063_s15] sm:$0x1] }
 0x1ec   :  { %v265_v16 = vpop.f32.mrf.mxu2 }
 0x1ed   :  { %v274_v17 = vpack.c.bf16 %v265_v16, %v265_v16 }
 0x1ef   :  { %v402_v20 = vunpack.c.l.b16 %v274_v17 }
 0x1f4   :  { %v267_v18 = vpop.f32.mrf.mxu2 }
 0x1f5   :  { %v275_v19 = vpack.c.bf16 %v267_v18, %v267_v18 }
 0x1f7   :  { %v403_v21 = vunpack.c.l.b16 %v275_v19 }
 0x1f9   :  { %v404_v22 = vpack.c.b16 %v403_v21, %v402_v20 }
 0x1fb   :  { %722 = vmatmul.msk.bf16.vlgmr.msrb.gmra.mxu0 %vm296_vm5, %v404_v22 }
 0x258   :  { %v347_v27 = vpop.f32.mrf.mxu1 }
 0x259   :  { %v352_v35 = vadd.f32 %v347_v27, %v310_v32 }
 0x260   :  { %v349_v31 = vpop.f32.mrf.mxu1 }
 0x261   :  { %v353_v36 = vadd.f32 %v349_v31, %v312_v33 }
 0x26e   :  { %v388_v28 = vpop.f32.mrf.mxu3 }
 0x26f   :  { %v393_v37 = vadd.f32 %v388_v28, %v352_v35 }
 0x276   :  { %v390_v34 = vpop.f32.mrf.mxu3 }
 0x277   :  { %v394_v38 = vadd.f32 %v390_v34, %v353_v36 }
 0x278   :  { %v429_v30 = vpop.f32.mrf.mxu0 }
 0x279   :  { %v434_v40 = vadd.f32 %v429_v30, %v393_v37 }
 0x280   :  { %v431_v39 = vpop.f32.mrf.mxu0 }
 0x281   :  { %v435_v41 = vadd.f32 %v431_v39, %v394_v38 }
 0x283   :  { %v436_v42 = vpack.c.bf16 %v435_v41, %v434_v40 }
 0x285   :  { %v480_v43 = vsel %vm296_vm5, %v436_v42, 0 }
 0x286   :  { %489 = vmatpush.bf16.xpose.msrb.mxu1 %v480_v43 }
 0x28d   :  { %731 = vmatmul.msk.bf16.vlgmr.msrb.gmra.mxu1 %vm296_vm5, %v468_v44 }
 0x30a   :  { %v491_v57 = vpop.f32.mrf.mxu1 }
 0x30b   :  { %v492_v58 = vadd.f32 %v491_v57, %v447_v55 }
 0x30d   :  { %v495_v59 = vpack.c.bf16 %v492_v58, %v492_v58 }
 0x30f   :  { %736 = vmatmul.msk.bf16.vlgmr.msrb.gmra.mxu3 %vm86_vm0, %v495_v59 }
 0x312   :  { %v493_v60 = vpop.f32.mrf.mxu1 }
 0x392   :  { %v517_v63 = vpop.f32.mrf.mxu3 }
 0x393   :  { %v518_v0 = vadd.f32 %v517_v63, %v498_v62 }
 0x395   :  { %v521_v1 = vpack.c.bf16 %v518_v0, %v518_v0 }
 0x397   :  { %761 = vmatmul.msk.bf16.vlgmr.msra.gmra.mxu2 %vm575_vm7, %v521_v1 }
 0x39a   :  { %v519_v2 = vpop.f32.mrf.mxu3 }
 0x41a   :  { %v592_v9 = vpop.f32.mrf.mxu2 }
 0x41b   :  { %v593_v10 = vadd.f32 %v592_v9, %v535_v8 }
 0x41d   :  { %vm596_vm8 = vcmp.gt.f32.partialorder %v593_v10, 0.0  ;;  %v597_v11 = vmul.f32 0.01, %v593_v10 }
 0x41f   :  { %v598_v12 = vsel %vm596_vm8, %v593_v10, %v597_v11 }
 0x420   :  { %v599_v13 = vpack.c.bf16 %v598_v12, %v598_v12 }
 0x422   :  { %766 = vmatmul.msk.bf16.vlgmr.msra.gmra.mxu0 %vm613_vm9, %v599_v13  ;;  %v594_v14 = vpop.f32.mrf.mxu2 }
 0x49f   :  { %v629_v16 = vpop.f32.mrf.mxu0 }
 0x4a0   :  { %v630_v17 = vadd.f32 %v629_v16, %v603_v15 }
 0x4a2   :  { %634 = vst.msk [vmem:[#allocation3] sm:$0x1] %vm633_vm10, %v630_v17 }
 0x4a3   :  { %645 = dma.vmem_to_hbm [thread:$0]  %s641_s14, 16, %s643_s23, [#allocation4]  }
 0x4a7   :  { %v631_v18 = vpop.f32.mrf.mxu0 }
 0x4a8   :  { %819 = dma.done.wait [#allocation4], 16  }
 0x4a9   :  { %820 = vsyncadd [#allocation4], 4294967280 }
 0x4aa   :  { %650 = vsyncpa [#allocation4], 1 }

</bundles_post_ra>
